<compile_context>
chip_gen: v5e
topology: v5e:2x2
jax: 0.10.0
libtpu: 0.0.40
codegen_flags: <defaults>
</compile_context>

<pallas_src>
import math
from functools import partial

import jax
import jax.numpy as jnp
from jax.experimental import pallas as pl
from jax.experimental.pallas import tpu as pltpu


def _batchnorm_rows_kernel(x_ref, g_ref, b_ref, o_ref, *, inv_n: float, eps: float):
    # x_ref: [TC, N] f32 -- one block of channels, full (B*H*W) reduction axis on lanes.
    # g_ref, b_ref: [TC, 1] f32 (per-channel affine parameters).
    x = x_ref[...]
    mean = jnp.sum(x, axis=1, keepdims=True) * inv_n                 # [TC, 1]
    xc = x - mean
    var = jnp.sum(xc * xc, axis=1, keepdims=True) * inv_n            # biased var (training BN)
    inv_std = jax.lax.rsqrt(var + eps)                               # EUP
    o_ref[...] = xc * (inv_std * g_ref[...]) + b_ref[...]


def batchnorm2d_pallas(x, gamma, beta, *, eps=1e-5):
    """Training-mode BatchNorm2d forward. x: [B, C, H, W] -> [B, C, H, W], float32."""
    B, C, H, W = x.shape
    N = B * H * W

    # Lane-dense layout: channel rows, full reduction axis on lanes.
    x_rows = jnp.transpose(x.astype(jnp.float32), (1, 0, 2, 3)).reshape(C, N)
    g = gamma.astype(jnp.float32).reshape(C, 1)
    b = beta.astype(jnp.float32).reshape(C, 1)

    # Channel tile: a multiple of 8 sublanes when C allows it, else the full C
    # (block dims must be divisible by (8, 128) or equal the full array dims).
    tc = min(C, 64) if C % 8 == 0 else C
    grid = (pl.cdiv(C, tc),)

    kernel = partial(_batchnorm_rows_kernel, inv_n=1.0 / N, eps=float(eps))

    y_rows = pl.pallas_call(
        kernel,
        out_shape=jax.ShapeDtypeStruct((C, N), jnp.float32),
        grid_spec=pltpu.PrefetchScalarGridSpec(
            num_scalar_prefetch=0,
            grid=grid,
            in_specs=[
                pl.BlockSpec((tc, N), lambda i: (i, 0)),
                pl.BlockSpec((tc, 1), lambda i: (i, 0)),
                pl.BlockSpec((tc, 1), lambda i: (i, 0)),
            ],
            out_specs=pl.BlockSpec((tc, N), lambda i: (i, 0)),
        ),
        compiler_params=pltpu.CompilerParams(
            dimension_semantics=("parallel",),
        ),
    )(x_rows, g, b)

    # TODO(synk): for very large B*H*W, tile the reduction axis too (two-pass sum /
    # sum-of-squares accumulation) instead of a full-N block per channel tile.
    return jnp.transpose(y_rows.reshape(C, B, H, W), (1, 0, 2, 3))


def prenorm_cross_attention(x, context, gamma, beta, fn, *, eps=1e-5):
    """Forward of PreNormCrossAttention: fn(BatchNorm2d(x), context)."""
    # TODO(synk): `fn` is an arbitrary sub-module in the PyTorch spec; once its
    # definition is fixed (CrossAttention in CPDM) it should be fused into the
    # Pallas kernel instead of being applied as a separate JAX callable.
    return fn(batchnorm2d_pallas(x, gamma, beta, eps=eps), context)


# ----------------------- demo `fn`: a small cross-attention ------------------------

def make_cross_attention_fn(key, dim, ctx_dim, inner_dim=32):
    kq, kk, kv, ko = jax.random.split(key, 4)
    wq = 0.1 * jax.random.normal(kq, (dim, inner_dim), jnp.float32)
    wk = 0.1 * jax.random.normal(kk, (ctx_dim, inner_dim), jnp.float32)
    wv = 0.1 * jax.random.normal(kv, (ctx_dim, inner_dim), jnp.float32)
    wo = 0.1 * jax.random.normal(ko, (inner_dim, dim), jnp.float32)
    scale = 1.0 / math.sqrt(inner_dim)

    def fn(x_norm, context):
        # x_norm: [B, C, H, W], context: [B, S, ctx_dim]
        B, C, H, W = x_norm.shape
        xr = jnp.transpose(x_norm, (0, 2, 3, 1)).reshape(B, H * W, C)
        q = xr @ wq
        k = context @ wk
        v = context @ wv
        attn = jax.nn.softmax(jnp.einsum("bqd,bkd->bqk", q, k) * scale, axis=-1)
        out = jnp.einsum("bqk,bkd->bqd", attn, v) @ wo
        return jnp.transpose(out.reshape(B, H, W, C), (0, 3, 1, 2))

    return fn


def _batchnorm2d_ref(x, gamma, beta, eps=1e-5):
    mean = jnp.mean(x, axis=(0, 2, 3), keepdims=True)
    var = jnp.mean((x - mean) ** 2, axis=(0, 2, 3), keepdims=True)
    return (x - mean) / jnp.sqrt(var + eps) * gamma.reshape(1, -1, 1, 1) + beta.reshape(1, -1, 1, 1)


if __name__ == "__main__":
    key = jax.random.PRNGKey(0)
    kx, kc, kg, kb, kf = jax.random.split(key, 5)

    B, C, H, W = 2, 4, 16, 16     # x: [B, dim, H, W]
    S, CTX = 8, 32                # context: [B, seq, ctx_dim]

    x = jax.random.normal(kx, (B, C, H, W), jnp.float32)
    context = jax.random.normal(kc, (B, S, CTX), jnp.float32)
    gamma = 1.0 + 0.1 * jax.random.normal(kg, (C,), jnp.float32)
    beta = 0.1 * jax.random.normal(kb, (C,), jnp.float32)

    fn = make_cross_attention_fn(kf, C, CTX)

    out = prenorm_cross_attention(x, context, gamma, beta, fn)
    out = jax.block_until_ready(out)

    # End-to-end reference: same fn applied to a pure-JAX BatchNorm2d.
    ref = fn(_batchnorm2d_ref(x, gamma, beta), context)
    assert out.shape == (B, C, H, W)
    assert out.dtype == jnp.float32
    assert jnp.allclose(out, ref, atol=1e-5, rtol=1e-5), "mismatch vs reference (full forward)"

    # Direct check of the Pallas BatchNorm kernel alone.
    bn = jax.block_until_ready(batchnorm2d_pallas(x, gamma, beta))
    assert jnp.allclose(bn, _batchnorm2d_ref(x, gamma, beta), atol=1e-5, rtol=1e-5), \
        "mismatch vs reference (batchnorm)"

    print("KERNEL_OK")
</pallas_src>

<mosaic_0001>
module attributes {stable_mosaic.version = 11 : i64} {
  func.func @_batchnorm_rows_kernel(%arg0: i32, %arg1: memref<4x512xf32, #tpu.memory_space<vmem>>, %arg2: memref<4x1xf32, #tpu.memory_space<vmem>>, %arg3: memref<4x1xf32, #tpu.memory_space<vmem>>, %arg4: memref<4x512xf32, #tpu.memory_space<vmem>>) attributes {dimension_semantics = [#tpu.dimension_semantics<parallel>], iteration_bounds = array<i64: 1>, scalar_prefetch = 0 : i64, scratch_operands = 0 : i64, tpu.core_type = #tpu.core_type<tc>, window_params = [{transform_indices = @transform_0, window_bounds = array<i64: 4, 512>}, {transform_indices = @transform_1, window_bounds = array<i64: 4, 1>}, {transform_indices = @transform_2, window_bounds = array<i64: 4, 1>}, {transform_indices = @transform_3, window_bounds = array<i64: 4, 512>}]} {
    %c0 = arith.constant 0 : index
    %c0_0 = arith.constant 0 : index
    %0 = vector.load %arg1[%c0, %c0_0] : memref<4x512xf32, #tpu.memory_space<vmem>>, vector<4x512xf32>
    %cst = arith.constant dense<0.000000e+00> : vector<4xf32>
    %1 = vector.multi_reduction <add>, %0, %cst [1] : vector<4x512xf32> to vector<4xf32>
    %2 = vector.shape_cast %1 : vector<4xf32> to vector<4x1xf32>
    %cst_1 = arith.constant 0.001953125 : f32
    %3 = vector.broadcast %cst_1 : f32 to vector<4x1xf32>
    %4 = arith.mulf %2, %3 : vector<4x1xf32>
    %5 = vector.broadcast %4 : vector<4x1xf32> to vector<4x512xf32>
    %6 = arith.subf %0, %5 : vector<4x512xf32>
    %7 = arith.mulf %6, %6 : vector<4x512xf32>
    %cst_2 = arith.constant dense<0.000000e+00> : vector<4xf32>
    %8 = vector.multi_reduction <add>, %7, %cst_2 [1] : vector<4x512xf32> to vector<4xf32>
    %9 = vector.shape_cast %8 : vector<4xf32> to vector<4x1xf32>
    %cst_3 = arith.constant 0.001953125 : f32
    %10 = vector.broadcast %cst_3 : f32 to vector<4x1xf32>
    %11 = arith.mulf %9, %10 : vector<4x1xf32>
    %cst_4 = arith.constant 9.99999974E-6 : f32
    %12 = vector.broadcast %cst_4 : f32 to vector<4x1xf32>
    %13 = arith.addf %11, %12 : vector<4x1xf32>
    %14 = math.rsqrt %13 : vector<4x1xf32>
    %c0_5 = arith.constant 0 : index
    %c0_6 = arith.constant 0 : index
    %15 = vector.load %arg2[%c0_5, %c0_6] : memref<4x1xf32, #tpu.memory_space<vmem>>, vector<4x1xf32>
    %16 = arith.mulf %14, %15 : vector<4x1xf32>
    %17 = vector.broadcast %16 : vector<4x1xf32> to vector<4x512xf32>
    %18 = arith.mulf %6, %17 : vector<4x512xf32>
    %c0_7 = arith.constant 0 : index
    %c0_8 = arith.constant 0 : index
    %19 = vector.load %arg3[%c0_7, %c0_8] : memref<4x1xf32, #tpu.memory_space<vmem>>, vector<4x1xf32>
    %20 = vector.broadcast %19 : vector<4x1xf32> to vector<4x512xf32>
    %21 = arith.addf %18, %20 : vector<4x512xf32>
    %c0_9 = arith.constant 0 : index
    %c0_10 = arith.constant 0 : index
    %22 = vector.load %arg4[%c0_9, %c0_10] : memref<4x512xf32, #tpu.memory_space<vmem>>, vector<4x512xf32>
    tpu.vector_store %arg4[%c0_9, %c0_10], %21 {strides = array<i32>} : memref<4x512xf32, #tpu.memory_space<vmem>>, vector<4x512xf32>,
    return
  }
  func.func @transform_0(%arg0: i32) -> (i32, i32) {
    %c0_i32 = arith.constant 0 : i32
    %c0_i32_0 = arith.constant 0 : i32
    return %arg0, %c0_i32 : i32, i32
  }
  func.func @transform_1(%arg0: i32) -> (i32, i32) {
    %c0_i32 = arith.constant 0 : i32
    %c0_i32_0 = arith.constant 0 : i32
    return %arg0, %c0_i32 : i32, i32
  }
  func.func @transform_2(%arg0: i32) -> (i32, i32) {
    %c0_i32 = arith.constant 0 : i32
    %c0_i32_0 = arith.constant 0 : i32
    return %arg0, %c0_i32 : i32, i32
  }
  func.func @transform_3(%arg0: i32) -> (i32, i32) {
    %c0_i32 = arith.constant 0 : i32
    %c0_i32_0 = arith.constant 0 : i32
    return %arg0, %c0_i32 : i32, i32
  }
}

</mosaic_0001>

<bundles_post_ra>
// kernel: tpu_custom_call.1
= control target key start
LH: loop header
LB: loop body
LE: loop exit
PB: predicated region body
PF: predicated region fallthrough
CT: control target
= control target key end

     0   :  { %8 = vsyncpa [#allocation3], 0  ;;  %s247_s0 = inlined_call_operand.hbm [shape: f32[4,512], index: 0, kind: input, shape index: {}]   ;;  %s248_s1 = inlined_call_operand.vmem [shape: f32[4,1], index: 1, kind: input, shape index: {}]   ;;  %s249_s2 = inlined_call_operand.vmem [shape: f32[4,1], index: 2, kind: input, shape index: {}]   ;;  %s250_s3 = inlined_call_operand.hbm [shape: f32[4,512], index: 3, kind: output, shape index: {}]  }
   0x1   :  { %9 = vsyncpa [#allocation4], 0  ;;  %s15_s14 = sshll.u32 %s247_s0, 4  ;;  %s203_s15 = smov [#allocation2]   ;;  %s16_s14 = int_to_ptr.hbm [resolvable:$true] %s15_s14 }
   0x2   :  { %s17_s16 = sshll.u32 %s203_s15, 4  ;;  %s18_s16 = int_to_ptr.vmem [resolvable:$true] %s17_s16 }
   0x3   :  { %20 = dma.hbm_to_vmem [thread:$0]  %s16_s14, 256, %s18_s16, [#allocation3]  }
   0x4   :  { %199 = dma.done.wait [#allocation3], 256  }
   0x5   :  { %200 = vsyncadd [#allocation3], 4294967040  ;;  %v29_v0 = vld [vmem:[#allocation2] sm:$0xff]  ;;  %v30_v1 = vld [vmem:[#allocation2 + $0x8] sm:$0xff]  ;;  %vm44_vm0 = vcmask 1043456   ;;  %v205_v34 = vmov 0  }
   0x6   :  { %33 = vst [vmem:[#allocation1] ss:$2 sm:$0xff] %v29_v0  ;;  %v204_v13 = vmov 839922192   ;;  %147 = vset.pattern.permute.xlu1 %v205_v34  ;;  %148 = vset.pattern.permute.xlu0 %v205_v34  ;;  %v99_v44 = vld [vmem:[%s248_s1] sm:$0xf] }
   0x7   :  { %35 = vst [vmem:[#allocation1 + $0x10] ss:$2 sm:$0xff] %v30_v1  ;;  %v57_v14 = vunpack.c.l.s4 %v204_v13  ;;  %v112_v47 = vld [vmem:[%s249_s2] sm:$0xf]  ;;  %s206_s20 = smov [#allocation5]   ;;  %s133_s1 = sshll.u32 %s250_s3, 4  ;;  %s134_s1 = int_to_ptr.hbm [resolvable:$true] %s133_s1 }
   0x8   :  { %s131_s21 = sshll.u32 %s206_s20, 4  ;;  %s132_s21 = int_to_ptr.vmem [resolvable:$true] %s131_s21 }
   0x9   :  { %v58_v15 = vunpack.c.0.s8 %v57_v14 }
   0xd   :  { %v36_v2 = vld.sshfl [vmem:[#allocation1] sm:$0xff pattern:$0x75316420]  ;;  %v37_v3 = vld.sshfl [vmem:[#allocation1 + $0x8] sm:$0xff pattern:$0x75316420] }
   0xe   :  { %v38_v4 = vld.sshfl [vmem:[#allocation1 + $0x10] sm:$0xff pattern:$0x75316420]  ;;  %v39_v5 = vld.sshfl [vmem:[#allocation1 + $0x18] sm:$0xff pattern:$0x75316420] }
   0xf   :  { %v45_v6 = vsel %vm44_vm0, %v36_v2, 0.0  ;;  %v46_v7 = vsel %vm44_vm0, %v37_v3, 0.0  ;;  %v48_v8 = vsel %vm44_vm0, %v38_v4, 0.0  ;;  %v50_v10 = vsel %vm44_vm0, %v39_v5, 0.0 }
  0x10   :  { %v47_v9 = vadd.f32 %v46_v7, %v45_v6 }
  0x12   :  { %v49_v11 = vadd.f32 %v48_v8, %v47_v9 }
  0x14   :  { %v51_v12 = vadd.f32 %v50_v10, %v49_v11 }
  0x16   :  { %52 = vadd.xlane.f32.xlu0 %v51_v12 }
  0x89   :  { %v53_v16 = vpop.xlane.xlu0 %52 }
  0x8a   :  { %v54_v17 = vmul.f32 0.001953125, %v53_v16 }
  0x8c   :  { %v59_v18 = vperm.slane %v54_v17, %v58_v15 }
  0x8e   :  { %v61_v19 = vsub.f32 %v29_v0, %v59_v18  ;;  %v62_v20 = vsub.f32 %v30_v1, %v59_v18 }
  0x90   :  { %v63_v21 = vmul.f32 %v61_v19, %v61_v19  ;;  %v64_v22 = vmul.f32 %v62_v20, %v62_v20 }
  0x92   :  { %67 = vst [vmem:[#allocation1] ss:$2 sm:$0xff] %v63_v21 }
  0x93   :  { %69 = vst [vmem:[#allocation1 + $0x10] ss:$2 sm:$0xff] %v64_v22 }
  0x99   :  { %v70_v23 = vld.sshfl [vmem:[#allocation1] sm:$0xff pattern:$0x75316420]  ;;  %v71_v24 = vld.sshfl [vmem:[#allocation1 + $0x8] sm:$0xff pattern:$0x75316420] }
  0x9a   :  { %v72_v25 = vld.sshfl [vmem:[#allocation1 + $0x10] sm:$0xff pattern:$0x75316420]  ;;  %v78_v26 = vsel %vm44_vm0, %v70_v23, 0.0  ;;  %v79_v27 = vsel %vm44_vm0, %v71_v24, 0.0 }
  0x9b   :  { %v73_v28 = vld.sshfl [vmem:[#allocation1 + $0x18] sm:$0xff pattern:$0x75316420]  ;;  %v80_v29 = vadd.f32 %v79_v27, %v78_v26  ;;  %v81_v30 = vsel %vm44_vm0, %v72_v25, 0.0 }
  0x9c   :  { %v83_v32 = vsel %vm44_vm0, %v73_v28, 0.0 }
  0x9d   :  { %v82_v31 = vadd.f32 %v81_v30, %v80_v29 }
  0x9f   :  { %v84_v33 = vadd.f32 %v83_v32, %v82_v31 }
  0xa1   :  { %85 = vadd.xlane.f32.xlu0 %v84_v33 }
 0x114   :  { %v86_v35 = vpop.xlane.xlu0 %85 }
 0x115   :  { %v87_v36 = vmul.f32 0.001953125, %v86_v35 }
 0x117   :  { %v88_v37 = vadd.f32 1e-05, %v87_v36 }
 0x119   :  { %149 = vrsqrt.f32 %v88_v37  ;;  %vm95_vm2 = vweird.f32 %v88_v37 }
 0x11f   :  { %v150_v38 = vpop.eup %149 }
 0x120   :  { %v90_v39 = vmul.f32 %v150_v38, %v88_v37  ;;  %vm96_vm1 = vweird.f32 %v150_v38 }
 0x121   :  { %vm97_vm3 = vmor %vm95_vm2, %vm96_vm1 }
 0x122   :  { %v91_v40 = vmul.f32 %v150_v38, %v90_v39 }
 0x124   :  { %v92_v41 = vmul.f32 0.5, %v91_v40 }
 0x126   :  { %v93_v42 = vsub.f32 1.5, %v92_v41 }
 0x128   :  { %v94_v43 = vmul.f32 %v150_v38, %v93_v42 }
 0x12a   :  { %v98_v45 = vsel %vm97_vm3, %v150_v38, %v94_v43 }
 0x12b   :  { %v100_v46 = vmul.f32 %v99_v44, %v98_v45 }
 0x12d   :  { %103 = vperm.xlu1 %147, %v100_v46  }
 0x135   :  { %115 = vperm.xlu1 %147, %v112_v47  }
 0x19f   :  { %v104_v48 = vpop.permute.xlu1 %103 }
 0x1a0   :  { %v108_v49 = vperm.slane %v104_v48, %v58_v15 }
 0x1a2   :  { %v110_v51 = vmul.f32 %v108_v49, %v61_v19  ;;  %v111_v52 = vmul.f32 %v108_v49, %v62_v20 }
 0x1a7   :  { %v116_v50 = vpop.permute.xlu1 %115 }
 0x1a8   :  { %v120_v53 = vperm.slane %v116_v50, %v58_v15 }
 0x1aa   :  { %v122_v54 = vadd.f32 %v120_v53, %v110_v51  ;;  %v123_v55 = vadd.f32 %v120_v53, %v111_v52 }
 0x1ac   :  { %124 = vst [vmem:[#allocation5] sm:$0xff] %v122_v54 }
 0x1ad   :  { %125 = vst [vmem:[#allocation5 + $0x8] sm:$0xff] %v123_v55 }
 0x1ae   :  { %136 = dma.vmem_to_hbm [thread:$0]  %s132_s21, 256, %s134_s1, [#allocation4]  }
 0x1af   :  { %201 = dma.done.wait [#allocation4], 256  }
 0x1b0   :  { %202 = vsyncadd [#allocation4], 4294967040 }
 0x1b1   :  { %141 = vsyncpa [#allocation3], 1 }
 0x1b2   :  { %142 = vsyncpa [#allocation4], 1 }

</bundles_post_ra>
